<compile_context>
chip_gen: v7x
topology: tpu7x:2x2x1
jax: 0.10.0
libtpu: 0.0.40
codegen_flags: <defaults>
</compile_context>

<pallas_src>
import jax
import jax.numpy as jnp
import numpy as np
from jax.experimental import pallas as pl
from jax.experimental.pallas import tpu as pltpu

LANE = 128  # TPU lane width; batch tiles map onto the lane axis.


def simple_model_kernel(x_ref, w_ref, o_ref):
    # x_ref: (2, TB) f32 VMEM  -- feature-major, batch on the lane axis (lane-dense).
    # w_ref: (2,)    f32 SMEM  -- folded effective weight of the whole linear net.
    # o_ref: (1, TB) f32 VMEM  -- lane-dense output row (unmasked vst).
    # Pure VPU work: two scalar-broadcast multiply-adds, one vector store.
    o_ref[...] = x_ref[0:1, :] * w_ref[0] + x_ref[1:2, :] * w_ref[1]


def simple_model(x, w1, w2, w3, *, tb=LANE):
    """x: (B, 2) f32; w1, w2: (2, 2); w3: (1, 4) — PyTorch (out, in) weight layout."""
    x = jnp.asarray(x, jnp.float32)
    B = x.shape[0]

    # Fold the purely-linear network into one (2,) effective weight:
    #   concat(x @ W1.T, x @ W2.T) @ W3.T == x @ (concat(W1.T, W2.T, axis=1) @ W3.T)
    # Under jit with constant weights this constant-folds; per-call cost is an
    # 8-byte SMEM scalar pair.
    w_eff = (jnp.concatenate([w1.T, w2.T], axis=1) @ w3.T).reshape(2).astype(jnp.float32)

    # Lane-dense layout: batch on the lane axis, padded to a multiple of the tile.
    n_tiles = pl.cdiv(B, tb)
    b_pad = n_tiles * tb
    x_t = jnp.zeros((2, b_pad), dtype=jnp.float32).at[:, :B].set(x.T)

    out = pl.pallas_call(
        simple_model_kernel,
        out_shape=jax.ShapeDtypeStruct((1, b_pad), jnp.float32),
        grid=(n_tiles,),
        in_specs=[
            pl.BlockSpec((2, tb), lambda i: (0, i)),            # x tile -> VMEM
            pl.BlockSpec(memory_space=pltpu.MemorySpace.SMEM),  # folded weight -> SMEM
        ],
        out_specs=pl.BlockSpec((1, tb), lambda i: (0, i)),      # lane-dense output row
        compiler_params=pltpu.CompilerParams(
            dimension_semantics=("parallel",),                  # megacore sharding on v7x
        ),
    )(x_t, w_eff)

    # Back to the module's (B, 1) output layout.
    return out[0, :B].reshape(B, 1)


if __name__ == "__main__":
    # Deterministic parameters, exactly as in SimpleModel.__init__ ((out, in) layout).
    w1 = jnp.array([[1.0, 2.0], [0.0, 1.0]], dtype=jnp.float32)  # layer1.weight
    w2 = jnp.array([[2.0, 3.0], [0.0, 0.0]], dtype=jnp.float32)  # layer2.weight
    w3 = jnp.array([[1.0, 4.0, 5.0, 0.0]], dtype=jnp.float32)    # layer3.weight

    key = jax.random.PRNGKey(0)
    x = jax.random.normal(key, (8, 2), dtype=jnp.float32)        # batch=8, features=2

    out = simple_model(x, w1, w2, w3)
    jax.block_until_ready(out)

    # Pure-JAX reference of the original (unfolded) PyTorch forward.
    y1 = x @ w1.T
    y2 = x @ w2.T
    ref = jnp.concatenate([y1, y2], axis=1) @ w3.T

    assert out.shape == (8, 1)
    np.testing.assert_allclose(np.asarray(out), np.asarray(ref), rtol=1e-5, atol=1e-5)
    print("KERNEL_OK")
</pallas_src>

<mosaic_0001>
module attributes {stable_mosaic.version = 11 : i64} {
  func.func @simple_model_kernel(%arg0: i32, %arg1: memref<2x128xf32, #tpu.memory_space<vmem>>, %arg2: memref<2xf32, #tpu.memory_space<smem>>, %arg3: memref<1x128xf32, #tpu.memory_space<vmem>>) attributes {dimension_semantics = [#tpu.dimension_semantics<parallel>], iteration_bounds = array<i64: 1>, scalar_prefetch = 0 : i64, scratch_operands = 0 : i64, tpu.core_type = #tpu.core_type<tc>, window_params = [{transform_indices = @transform_0, window_bounds = array<i64: 2, 128>}, {transform_indices = @transform_1, window_bounds = array<i64: 2>}, {transform_indices = @transform_2, window_bounds = array<i64: 1, 128>}]} {
    %c0 = arith.constant 0 : index
    %c0_0 = arith.constant 0 : index
    %0 = vector.load %arg1[%c0, %c0_0] : memref<2x128xf32, #tpu.memory_space<vmem>>, vector<1x128xf32>
    %c0_1 = arith.constant 0 : index
    %1 = memref.load %arg2[%c0_1] : memref<2xf32, #tpu.memory_space<smem>>
    %2 = vector.broadcast %1 : f32 to vector<1x128xf32>
    %3 = arith.mulf %0, %2 : vector<1x128xf32>
    %c1 = arith.constant 1 : index
    %c0_2 = arith.constant 0 : index
    %4 = vector.load %arg1[%c1, %c0_2] : memref<2x128xf32, #tpu.memory_space<vmem>>, vector<1x128xf32>
    %c1_3 = arith.constant 1 : index
    %5 = memref.load %arg2[%c1_3] : memref<2xf32, #tpu.memory_space<smem>>
    %6 = vector.broadcast %5 : f32 to vector<1x128xf32>
    %7 = arith.mulf %4, %6 : vector<1x128xf32>
    %8 = arith.addf %3, %7 : vector<1x128xf32>
    %c0_4 = arith.constant 0 : index
    %c0_5 = arith.constant 0 : index
    %9 = vector.load %arg3[%c0_4, %c0_5] : memref<1x128xf32, #tpu.memory_space<vmem>>, vector<1x128xf32>
    tpu.vector_store %arg3[%c0_4, %c0_5], %8 {strides = array<i32>} : memref<1x128xf32, #tpu.memory_space<vmem>>, vector<1x128xf32>,
    return
  }
  func.func @transform_0(%arg0: i32) -> (i32, i32) {
    %c0_i32 = arith.constant 0 : i32
    %c0_i32_0 = arith.constant 0 : i32
    return %c0_i32, %arg0 : i32, i32
  }
  func.func @transform_1(%arg0: i32) -> i32 {
    %c0_i32 = arith.constant 0 : i32
    %c0_i32_0 = arith.constant 0 : i32
    return %c0_i32 : i32
  }
  func.func @transform_2(%arg0: i32) -> (i32, i32) {
    %c0_i32 = arith.constant 0 : i32
    %c0_i32_0 = arith.constant 0 : i32
    return %c0_i32, %arg0 : i32, i32
  }
}

</mosaic_0001>

<bundles_post_ra>
// kernel: tpu_custom_call.1
= control target key start
LH: loop header
LB: loop body
LE: loop exit
PB: predicated region body
PF: predicated region fallthrough
CT: control target
= control target key end

     0   :  { %7 = vsyncpa [#allocation3], 0  ;;  %s174_s0 = inlined_call_operand.hbm [shape: f32[2,128], index: 0, kind: input, shape index: {}]   ;;  %s175_s1 = inlined_call_operand.vmem [shape: f32[2], index: 1, kind: input, shape index: {}]   ;;  %s176_s2 = inlined_call_operand.hbm [shape: f32[1,128], index: 2, kind: output, shape index: {}]  }
   0x1   :  { %8 = vsyncpa [#allocation5], 0 }
   0x2   :  { %9 = vsyncpa [#allocation4], 0  ;;  %s26_s11 = sshll.u32 %s175_s1, 4  ;;  %s129_s12 = smov [#allocation2]   ;;  %s27_s11 = int_to_ptr.vmem [resolvable:$true] %s26_s11 }
   0x3   :  { %s16_s13 = sshll.u32 %s129_s12, 4  ;;  %s67_s16 = scalar_lea.hbm %s174_s0, 32  ;;  %s17_s13 = int_to_ptr.vmem [resolvable:$true] %s16_s13 }
   0x4   :  { %p68_p0 = scmp.ne.s32.totalorder %s174_s0, %s67_s16  ;;  %p71_p1 = scmp.lt.u32.totalorder %s67_s16, %s174_s0 }
   0x6   :  { %p73_p2 = pnand %p71_p1, %p68_p0 }
   0x8   :  { %76 = shalt.err (!%p73_p2)
}
   0x9   :  { %s77_s21 = scalar_lea.vmem %s17_s13, 32  ;;  %p82_p4 = scmp.lt.s32.totalorder %s17_s13, %s17_s13 }
   0xa   :  { %p78_p3 = scmp.ne.s32.totalorder %s17_s13, %s77_s21  ;;  %p83_p5 = scmp.lt.s32.totalorder %s77_s21, %s77_s21 }
   0xc   :  { %p84_p6 = por %p83_p5, %p82_p4 }
   0xe   :  { %p85_p7 = pnand %p84_p6, %p78_p3 }
  0x10   :  { %88 = shalt.err (!%p85_p7)
}
  0x11   :  { %19 = dma.hbm_to_vmem [thread:$0]  %s174_s0, 32, %s17_s13, [#allocation3]  }
  0x12   :  { %s89_s23 = scalar_lea.vmem %s27_s11, 16  ;;  %p94_p9 = scmp.lt.s32.totalorder %s27_s11, %s27_s11 }
  0x13   :  { %p90_p8 = scmp.ne.s32.totalorder %s27_s11, %s89_s23  ;;  %p95_p10 = scmp.lt.s32.totalorder %s89_s23, %s89_s23 }
  0x15   :  { %p96_p11 = por %p95_p10, %p94_p9 }
  0x17   :  { %p97_p12 = pnand %p96_p11, %p90_p8 }
  0x19   :  { %100 = shalt.err (!%p97_p12)
}
  0x1a   :  { %s130_s24 = smov [#allocation6]  }
  0x1b   :  { %29 = dma.vmem_to_smem %s27_s11, 16, %s130_s24, [#allocation5]  }
  0x1c   :  { %123 = dma.done.wait [#allocation3], 32  }
  0x1d   :  { %124 = vsyncadd [#allocation3], 4294967264 }
  0x1e   :  { %125 = dma.done.wait [#allocation5], 16  }
  0x1f   :  { %126 = vsyncadd [#allocation5], 4294967280 }
  0x20   :  { %36 = sfence }
  0x21   :  { %s38_s25 = sld [smem:[#allocation6]]  ;;  %s63_s26 = sld [smem:[#allocation6 + $0x1]]  ;;  %v37_v0 = vld [vmem:[#allocation2] sm:$0x1]  ;;  %v41_v1 = vld [vmem:[#allocation2 + $0x1] sm:$0x1] }
  0x22   :  { %s131_s0 = smov [#allocation7]  }
  0x23   :  { %s53_s27 = sshll.u32 %s131_s0, 4  ;;  %s54_s27 = int_to_ptr.vmem [resolvable:$true] %s53_s27 }
  0x24   :  { %s101_s28 = scalar_lea.vmem %s54_s27, 16  ;;  %s105_s29 = scalar_lea.vmem %s54_s27, 32 }
  0x25   :  { %p102_p13 = scmp.ne.s32.totalorder %s54_s27, %s101_s28  ;;  %p106_p0 = scmp.lt.s32.totalorder %s54_s27, %s54_s27 }
  0x26   :  { %p107_p1 = scmp.lt.s32.totalorder %s105_s29, %s101_s28 }
  0x27   :  { %v39_v2 = vstv %s38_s25  ;;  %v43_v4 = vstv %s63_s26 }
  0x28   :  { %v40_v3 = vmul.f32 %v39_v2, %v37_v0  ;;  %v44_v5 = vmul.f32 %v43_v4, %v41_v1  ;;  %p108_p2 = por %p107_p1, %p106_p0 }
  0x2a   :  { %v45_v6 = vadd.f32 %v44_v5, %v40_v3  ;;  %p109_p3 = pnand %p108_p2, %p102_p13 }
  0x2c   :  { %46 = vst [vmem:[#allocation7] sm:$0x1] %v45_v6 }
  0x2d   :  { %112 = shalt.err (!%p109_p3)
}
  0x2e   :  { %s113_s4 = scalar_lea.hbm %s176_s2, 16 }
  0x2f   :  { %p114_p4 = scmp.ne.s32.totalorder %s176_s2, %s113_s4  ;;  %p117_p5 = scmp.lt.u32.totalorder %s113_s4, %s176_s2 }
  0x31   :  { %p119_p6 = pnand %p117_p5, %p114_p4 }
  0x33   :  { %122 = shalt.err (!%p119_p6)
}
  0x34   :  { %56 = dma.vmem_to_hbm [thread:$0]  %s54_s27, 16, %s176_s2, [#allocation4]  }
  0x35   :  { %127 = dma.done.wait [#allocation4], 16  }
  0x36   :  { %128 = vsyncadd [#allocation4], 4294967280 }
  0x37   :  { %60 = vsyncpa [#allocation3], 1 }
  0x38   :  { %61 = vsyncpa [#allocation4], 1 }
  0x39   :  { %62 = vsyncpa [#allocation5], 1 }

</bundles_post_ra>
